<compile_context>
chip_gen: v7x
topology: tpu7x:2x2x1
jax: 0.10.0
libtpu: 0.0.40
codegen_flags: <defaults>
</compile_context>

<pallas_src>
import functools

import jax
import jax.numpy as jnp
from jax.experimental import pallas as pl
from jax.experimental.pallas import tpu as pltpu


# ----------------------------------------------------------------------------
# Kernels
# ----------------------------------------------------------------------------
def _ei_dense_kernel_inplace(x_ref, w_ref, b_ref, o_ref, *, precision):
    """f32 output: accumulate straight into the resident output block.

    o_ref's BlockSpec returns (i, j) for every k, so the tile stays in VMEM
    across the reduction -- no scratch accumulator or final copy needed.
    """
    k = pl.program_id(2)

    @pl.when(k == 0)
    def _init():
        # Seed with the broadcast bias row: bias is added exactly once and the
        # vst-heavy epilogue pass disappears.
        o_ref[...] = jnp.broadcast_to(b_ref[...], o_ref.shape)

    x = x_ref[...]
    if x.dtype != w_ref.dtype:
        # In-kernel cast (cheap VPU op) instead of a wrapper-side astype that
        # would materialize a second copy of x in HBM.
        x = x.astype(w_ref.dtype)
    o_ref[...] += jnp.dot(x, w_ref[...],
                          preferred_element_type=jnp.float32,
                          precision=precision)


def _ei_dense_kernel_acc(x_ref, w_ref, b_ref, o_ref, acc_ref, *, precision):
    """Non-f32 output: f32 scratch accumulator, bias-add + cast on last K step."""
    k = pl.program_id(2)

    @pl.when(k == 0)
    def _init():
        acc_ref[...] = jnp.zeros_like(acc_ref)

    x = x_ref[...]
    if x.dtype != w_ref.dtype:
        x = x.astype(w_ref.dtype)
    acc_ref[...] += jnp.dot(x, w_ref[...],
                            preferred_element_type=jnp.float32,
                            precision=precision)

    @pl.when(k == pl.num_programs(2) - 1)
    def _finalize():
        o_ref[...] = (acc_ref[...] + b_ref[...]).astype(o_ref.dtype)


# ----------------------------------------------------------------------------
# Tile selection
# ----------------------------------------------------------------------------
def _pick_tile(dim, preferred, align, cap):
    """Largest preferred tile evenly dividing `dim`; else largest `align`-multiple
    divisor <= cap; else the full dim (legal: block == full array dim)."""
    for t in preferred:
        if dim >= t and dim % t == 0:
            return t
    t = cap - (cap % align)
    while t >= align:
        if dim % t == 0:
            return t
        t -= align
    return dim


def _select_tiles(B, n_output, n_input, x_bytes, w_bytes, out_bytes, use_acc):
    # Big M tile => weight re-streamed fewer times; big K tile => fewer
    # accumulator read-modify-write passes; tn/tk lane-dense (multiples of 128).
    tm = _pick_tile(B, (1024, 512, 256, 128, 64, 32, 16, 8), align=8, cap=512)
    tn = _pick_tile(n_output, (512, 256, 128), align=128, cap=512)
    tk = _pick_tile(n_input, (2048, 1024, 512, 256, 128), align=128, cap=1024)

    def footprint(tm, tn, tk):
        return (2 * tm * tk * x_bytes        # x tile, double-buffered
                + 2 * tk * tn * w_bytes      # W^T tile, double-buffered
                + 2 * tm * tn * out_bytes    # output tile, double-buffered
                + 2 * tn * 4                 # bias row
                + (tm * tn * 4 if use_acc else 0))

    # Conservative budget: fits v7x (64 MiB physical / 32 MiB scoped default)
    # with pipeline headroom; trivially fits v5e/v6e's 128 MiB.
    budget = 20 * 2 ** 20
    while footprint(tm, tn, tk) > budget:
        if tk > 128 and (tk // 2) % 128 == 0 and tk >= tn:
            tk //= 2
        elif tn > 128 and (tn // 2) % 128 == 0:
            tn //= 2
        elif tm > 8 and (tm // 2) % 8 == 0:
            tm //= 2
        else:
            break

    # v7x megacore: ensure at least one *parallel* grid axis has >= 2 blocks so
    # both TensorCores get work (harmless on single-TC v5e/v6e).
    if B // tm == 1 and n_output // tn == 1:
        if tn % 256 == 0:
            tn //= 2
        elif tm % 16 == 0:
            tm //= 2

    return tm, tn, tk


# ----------------------------------------------------------------------------
# Parameter prep + wrapper
# ----------------------------------------------------------------------------
def prepare_params(w_pos, d_w, b, compute_dtype=jnp.float32):
    """One-time parameter preparation (outside the per-step hot path).

    Folds D_W into the weight (exact for the diagonal +/-1 D_W: a per-column
    sign flip) and stores it transposed as (n_input, n_output) so the kernel
    consumes it directly; bias becomes an f32 (1, n_output) row.
    """
    w_t = (w_pos @ d_w).T.astype(compute_dtype)     # (n_input, n_output)
    b_row = b.reshape(1, -1).astype(jnp.float32)    # (1, n_output)
    return w_t, b_row


@functools.partial(jax.jit, static_argnames=("out_dtype", "precision"))
def column_ei_dense(x, w_t, b_row, *, out_dtype=jnp.float32, precision="default"):
    """x: (B, n_input); w_t: (n_input, n_output) sign-folded transposed weight;
    b_row: (1, n_output).  Returns (B, n_output).

    precision: "default" (fast, bf16 MXU passes) or "highest" (f32 parity)."""
    B, n_input = x.shape
    n_in_w, n_output = w_t.shape
    assert n_in_w == n_input and b_row.shape == (1, n_output)

    prec = jax.lax.Precision.HIGHEST if precision == "highest" else None
    out_dt = jnp.dtype(out_dtype)
    use_acc = out_dt != jnp.dtype(jnp.float32)

    x_bytes = jnp.dtype(x.dtype).itemsize
    w_bytes = jnp.dtype(w_t.dtype).itemsize
    out_bytes = out_dt.itemsize

    tm, tn, tk = _select_tiles(B, n_output, n_input,
                               x_bytes, w_bytes, out_bytes, use_acc)
    grid = (pl.cdiv(B, tm), pl.cdiv(n_output, tn), pl.cdiv(n_input, tk))
    grid_m, grid_n, _ = grid

    if use_acc:
        kernel = functools.partial(_ei_dense_kernel_acc, precision=prec)
        scratch = [pltpu.VMEM((tm, tn), jnp.float32)]
    else:
        kernel = functools.partial(_ei_dense_kernel_inplace, precision=prec)
        scratch = []

    # Bytes account for re-streaming: x is re-read per output-column block,
    # the weight per batch block.
    cost = pl.CostEstimate(
        flops=2 * B * n_input * n_output,
        transcendentals=0,
        bytes_accessed=(B * n_input * x_bytes * grid_n
                        + n_input * n_output * w_bytes * grid_m
                        + n_output * 4 * grid_m
                        + B * n_output * out_bytes),
    )

    # Explicit VMEM limit with headroom over the computed footprint (guards the
    # rare full-dim tile fallback); never below the 32 MiB scoped default.
    footprint = (2 * tm * tk * x_bytes + 2 * tk * tn * w_bytes
                 + 2 * tm * tn * out_bytes + 2 * tn * 4
                 + (tm * tn * 4 if use_acc else 0))
    vmem_limit = int(min(100 * 2 ** 20, max(32 * 2 ** 20, footprint * 5 // 4)))

    return pl.pallas_call(
        kernel,
        out_shape=jax.ShapeDtypeStruct((B, n_output), out_dt),
        grid_spec=pltpu.PrefetchScalarGridSpec(
            num_scalar_prefetch=0,
            grid=grid,
            in_specs=[
                pl.BlockSpec((tm, tk), lambda i, j, k: (i, k)),  # x tile
                pl.BlockSpec((tk, tn), lambda i, j, k: (k, j)),  # W^T tile (sign folded)
                pl.BlockSpec((1, tn), lambda i, j, k: (0, j)),   # bias row tile
            ],
            out_specs=pl.BlockSpec((tm, tn), lambda i, j, k: (i, j)),
            scratch_shapes=scratch,
        ),
        compiler_params=pltpu.CompilerParams(
            dimension_semantics=("parallel", "parallel", "arbitrary"),
            vmem_limit_bytes=vmem_limit,
        ),
        cost_estimate=cost,
    )(x, w_t, b_row)


# ----------------------------------------------------------------------------
# Synthetic params + reference (mirrors the PyTorch module).
# ----------------------------------------------------------------------------
def calculate_column_ei_layer_params(n_input, ratio):
    ni = max(1, int(round(n_input / (ratio + 1))))
    ne = n_input - ni
    return ne, ni


def make_params(key, n_input, n_output, ratio):
    k_w, k_b = jax.random.split(key)
    # W_pos ~ randn(n_output, n_input)
    w_pos = jax.random.normal(k_w, (n_output, n_input), dtype=jnp.float32)
    # Module initializes b = zeros(n_output, 1); random bias here so the test
    # actually exercises the bias path.
    b = jax.random.normal(k_b, (n_output, 1), dtype=jnp.float32)
    # D_W: diagonal sign matrix (+1 excitatory columns, -1 inhibitory columns).
    ne, ni = calculate_column_ei_layer_params(n_input, ratio)
    diag = jnp.concatenate([jnp.ones((ne,), jnp.float32),
                            -jnp.ones((ni,), jnp.float32)])
    d_w = jnp.diag(diag)
    return w_pos, d_w, b


def reference(x, w_pos, d_w, b):
    # Faithful f32 translation of the PyTorch forward.
    w = w_pos @ d_w
    z = jnp.matmul(w, x.T, precision=jax.lax.Precision.HIGHEST) + b
    return z.T


if __name__ == "__main__":
    key = jax.random.PRNGKey(0)
    kx, kp = jax.random.split(key)

    batch = 16
    n_input = 256
    n_output = 128
    ratio = 9

    x = jax.random.normal(kx, (batch, n_input), dtype=jnp.float32)
    w_pos, d_w, b = make_params(kp, n_input, n_output, ratio)
    ref = reference(x, w_pos, d_w, b)

    # --- f32 weights, parity path (Precision.HIGHEST, opt-in) ----------------
    w_t, b_row = prepare_params(w_pos, d_w, b, compute_dtype=jnp.float32)
    out_hi = jax.block_until_ready(
        column_ei_dense(x, w_t, b_row, precision="highest"))
    assert out_hi.shape == (batch, n_output)
    assert jnp.allclose(out_hi, ref, atol=1e-3, rtol=1e-3), "f32 parity mismatch"

    # --- f32 weights, production default (fast MXU passes) -------------------
    out_fast = jax.block_until_ready(column_ei_dense(x, w_t, b_row))
    assert out_fast.shape == (batch, n_output)
    assert jnp.allclose(out_fast, ref, atol=3e-1, rtol=5e-2), "f32 fast mismatch"

    # --- bf16 weights, f32 x cast inside the kernel (f32 accumulation) -------
    w_t16, b_row16 = prepare_params(w_pos, d_w, b, compute_dtype=jnp.bfloat16)
    out16 = jax.block_until_ready(column_ei_dense(x, w_t16, b_row16))
    ref16 = jnp.dot(x.astype(jnp.bfloat16), w_t16,
                    preferred_element_type=jnp.float32) + b_row16
    assert out16.shape == (batch, n_output)
    assert jnp.allclose(out16, ref16, atol=1e-2, rtol=1e-2), "bf16 path mismatch"

    print("KERNEL_OK")
</pallas_src>

<mosaic_0001>
module attributes {stable_mosaic.version = 11 : i64} {
  func.func @_ei_dense_kernel_inplace(%arg0: i32, %arg1: i32, %arg2: i32, %arg3: memref<8x256xf32, #tpu.memory_space<vmem>>, %arg4: memref<256x128xf32, #tpu.memory_space<vmem>>, %arg5: memref<1x128xf32, #tpu.memory_space<vmem>>, %arg6: memref<8x128xf32, #tpu.memory_space<vmem>>) attributes {dimension_semantics = [#tpu.dimension_semantics<parallel>, #tpu.dimension_semantics<parallel>, #tpu.dimension_semantics<arbitrary>], iteration_bounds = array<i64: 2, 1, 1>, scalar_prefetch = 0 : i64, scratch_operands = 0 : i64, tpu.core_type = #tpu.core_type<tc>, window_params = [{transform_indices = @transform_0, window_bounds = array<i64: 8, 256>}, {transform_indices = @transform_1, window_bounds = array<i64: 256, 128>}, {transform_indices = @transform_2, window_bounds = array<i64: 1, 128>}, {transform_indices = @transform_3, window_bounds = array<i64: 8, 128>}]} {
    %c0_i32 = arith.constant 0 : i32
    %0 = arith.cmpi eq, %arg2, %c0_i32 : i32
    %1 = arith.extui %0 : i1 to i32
    %c0_i32_0 = arith.constant 0 : i32
    %2 = arith.cmpi ne, %1, %c0_i32_0 : i32
    scf.if %2 {
      %c0_8 = arith.constant 0 : index
      %c0_9 = arith.constant 0 : index
      %9 = vector.load %arg5[%c0_8, %c0_9] : memref<1x128xf32, #tpu.memory_space<vmem>>, vector<1x128xf32>
      %10 = vector.shape_cast %9 : vector<1x128xf32> to vector<1x128xf32>
      %11 = vector.broadcast %10 : vector<1x128xf32> to vector<8x128xf32>
      %c0_10 = arith.constant 0 : index
      %c0_11 = arith.constant 0 : index
      %12 = vector.load %arg6[%c0_10, %c0_11] : memref<8x128xf32, #tpu.memory_space<vmem>>, vector<8x128xf32>
      tpu.vector_store %arg6[%c0_10, %c0_11], %11 {strides = array<i32>} : memref<8x128xf32, #tpu.memory_space<vmem>>, vector<8x128xf32>,
    } else {
    }
    %c0 = arith.constant 0 : index
    %c0_1 = arith.constant 0 : index
    %3 = vector.load %arg3[%c0, %c0_1] : memref<8x256xf32, #tpu.memory_space<vmem>>, vector<8x256xf32>
    %c0_2 = arith.constant 0 : index
    %c0_3 = arith.constant 0 : index
    %4 = vector.load %arg6[%c0_2, %c0_3] : memref<8x128xf32, #tpu.memory_space<vmem>>, vector<8x128xf32>
    %c0_4 = arith.constant 0 : index
    %c0_5 = arith.constant 0 : index
    %5 = vector.load %arg4[%c0_4, %c0_5] : memref<256x128xf32, #tpu.memory_space<vmem>>, vector<256x128xf32>
    %cst = arith.constant dense<0.000000e+00> : vector<8x128xf32>
    %6 = tpu.matmul %3, %5, %cst {dimension_numbers = #tpu.dot_dimension_numbers<[1], [0], [0], [1], [0, 0, 1, 1], [], []>, precision = #tpu.contract_precision<fp32>} : vector<8x256xf32>, vector<256x128xf32>, vector<8x128xf32> -> vector<8x128xf32>
    %7 = arith.addf %4, %6 : vector<8x128xf32>
    %c0_6 = arith.constant 0 : index
    %c0_7 = arith.constant 0 : index
    %8 = vector.load %arg6[%c0_6, %c0_7] : memref<8x128xf32, #tpu.memory_space<vmem>>, vector<8x128xf32>
    tpu.vector_store %arg6[%c0_6, %c0_7], %7 {strides = array<i32>} : memref<8x128xf32, #tpu.memory_space<vmem>>, vector<8x128xf32>,
    return
  }
  func.func @transform_0(%arg0: i32, %arg1: i32, %arg2: i32) -> (i32, i32) {
    %c0_i32 = arith.constant 0 : i32
    return %arg0, %arg2 : i32, i32
  }
  func.func @transform_1(%arg0: i32, %arg1: i32, %arg2: i32) -> (i32, i32) {
    %c0_i32 = arith.constant 0 : i32
    return %arg2, %arg1 : i32, i32
  }
  func.func @transform_2(%arg0: i32, %arg1: i32, %arg2: i32) -> (i32, i32) {
    %c0_i32 = arith.constant 0 : i32
    %c0_i32_0 = arith.constant 0 : i32
    return %c0_i32, %arg1 : i32, i32
  }
  func.func @transform_3(%arg0: i32, %arg1: i32, %arg2: i32) -> (i32, i32) {
    %c0_i32 = arith.constant 0 : i32
    return %arg0, %arg1 : i32, i32
  }
}

</mosaic_0001>

<bundles_post_ra>
// kernel: column_ei_dense.1
= control target key start
LH: loop header
LB: loop body
LE: loop exit
PB: predicated region body
PF: predicated region fallthrough
CT: control target
= control target key end

     0   :  { %8 = vsyncpa [#allocation3], 0  ;;  %s2578_s0 = inlined_call_operand.hbm [shape: f32[16,256], index: 0, kind: input, shape index: {}]   ;;  %s2579_s1 = inlined_call_operand.hbm [shape: f32[256,128], index: 1, kind: input, shape index: {}]   ;;  %s2580_s2 = inlined_call_operand.vmem [shape: f32[1,128], index: 2, kind: input, shape index: {}]   ;;  %s2581_s3 = inlined_call_operand.hbm [shape: f32[16,128], index: 3, kind: output, shape index: {}]  }
   0x1   :  { %10 = vsyncpa [#allocation3 + $0x1], 0 }
   0x2   :  { %11 = vsyncpa [#allocation6], 0 }
   0x3   :  { %12 = vsyncpa [#allocation4], 0 }
   0x4   :  { %14 = vsyncpa [#allocation4 + $0x1], 0  ;;  %s1958_s12 = smov 0   ;;  %s1960_s13 = smov 0  }
   0x5   :  { %s1962_s14 = smov 0   ;;  %s1964_s15 = smov 0  }
   0x6   :  { %s1966_s16 = smov 0   ;;  %s1968_s17 = smov 0  }
   0x7 LB: > { %s1291_s18 = sadd.s32 4294967295, %s1931_s17   ;;  %s1292_s19 = sadd.s32 4294967294, %s1931_s17   ;;  %s1931_s17 = sphi %s1968_s17, %s20_s17   ;;  %s1927_s16 = sphi %s1966_s16, %s2695_s16   ;;  %s1923_s15 = sphi %s1964_s15, %s2694_s15   ;;  %s1919_s14 = sphi %s1962_s14, %s2693_s14   ;;  %s1915_s13 = sphi %s1960_s13, %s2692_s13   ;;  %s1911_s12 = sphi %s1958_s12, %s2691_s12  }
   0x8   : > { %p61_p0 = scmp.ne.s32.totalorder %s1915_s13, %s1911_s12  ;;  %p1992_p1 = scmp.eq.s32.totalorder %s1291_s18, 0 }
   0x9   : > { %p1996_p2 = scmp.eq.s32.totalorder %s1291_s18, 1  ;;  %p147_p3 = scmp.eq.s32.totalorder %s1292_s19, 1 }
   0xa   : > { %s2631_s20 = scalar_select %p1992_p1, 1, 0 }
   0xb   : > { %s2632_s21 = scalar_select %p1996_p2, 1, 0 }
   0xc   : > { %p2002_p4 = por %p1992_p1, %p61_p0  ;;  %p1293_p5 = scmp.ge.s32.totalorder %s1931_s17, 1 }
   0xd   : > { %p2007_p6 = por %p147_p3, %p61_p0  ;;  %p154_p7 = scmp.lt.s32.totalorder %s1931_s17, 3 }
   0xe   : > { %s2633_s22 = scalar_select %p2002_p4, 1, 0 }
   0xf   : > { %s2634_s23 = scalar_select %p2007_p6, 1, 0 }
  0x10   : > { %p2012_p8 = pnand %p1293_p5, %p154_p7  ;;  %s1933_s25 = smov [#allocation5]  }
  0x11   : > { %s170_s26 = sshll.u32 %s1933_s25, 4  ;;  %s39_s28 = sadd.s32 1, %s1927_s16  ;;  %s171_s26 = int_to_ptr.vmem [resolvable:$true] %s170_s26 }
  0x12   : > { %s2635_s24 = scalar_select %p2012_p8, 1, 0 }
  0x13   : > { %p1720_p9 = pneg %p2012_p8  ;;  %s1787_s4 = scalar_lea.hbm %s2579_s1, 4096 }
  0x14   : > { %p1788_p12 = scmp.ne.s32.totalorder %s2579_s1, %s1787_s4  ;;  %p1794_p5 = scmp.lt.u32.totalorder %s1787_s4, %s2579_s1 }
  0x15   : > { %p2021_p11 = pnand %p1720_p9, %p1992_p1 }
  0x17   : > { %p1789_p13 = pneg %p2021_p11 }
  0x19   : > { %p1790_p0 = pnand %p1789_p13, %p1788_p12 }
  0x1b   : > { %p1791_p3 = pneg %p1790_p0 }
  0x1d   : > { %p1796_p7 = pnand %p1794_p5, %p1791_p3 }
  0x1f   : > { %1799 = shalt.err (!%p1796_p7)
}
  0x20   : > { %s1800_s9 = scalar_lea.vmem %s171_s26, 4096  ;;  %p1808_p1 = scmp.lt.s32.totalorder %s171_s26, %s171_s26 }
  0x21   : > { %p1801_p9 = scmp.ne.s32.totalorder %s171_s26, %s1800_s9  ;;  %p1809_p4 = scmp.lt.s32.totalorder %s1800_s9, %s1800_s9 }
  0x23   : > { %p1803_p10 = pnand %p1801_p9, %p1789_p13  ;;  %p1810_p8 = por %p1809_p4, %p1808_p1 }
  0x25   : > { %p1804_p6 = pneg %p1803_p10 }
  0x27   : > { %p1811_p2 = pnand %p1810_p8, %p1804_p6 }
  0x29   : > { %1814 = shalt.err (!%p1811_p2)
}
  0x2a   : > { %s1934_s10 = smov 128   ;;  %s1935_s11 = smov 8  }
  0x2b   : > { %1723 = dma.hbm_to_vmem [thread:$0]  (!%p2021_p11), %s2579_s1, 4096, %s171_s26, [#allocation6], %s1934_s10, %s1934_s10, %s1935_s11  }
  0x2c   : > { %p41_p1 = scmp.ge.s32.totalorder %s39_s28, 2  ;;  %s48_s25 = sadd.s32 1, %s1919_s14 }
  0x2d   : > { %p55_p2 = scmp.ne.s32.totalorder %s1919_s14, %s1915_s13  ;;  %p56_p4 = scmp.eq.s32.totalorder %s1931_s17, 0 }
  0x2e   : > { %s2697_s28 = smov (%p41_p1, %s39_s28), 0  ;;  %p2638_p8 = scmp.ne.s32.totalorder %s2632_s21, 0 }
  0x2f   : > { %p2048_p6 = por %p56_p4, %p55_p2  ;;  %s43_s27 = ssub.s32 %s1927_s16, %s2697_s28 }
  0x30   : > { %p2054_p10 = por %p2638_p8, %p55_p2  ;;  %p1733_p12 = scmp.lt.s32.totalorder %s1931_s17, 2 }
  0x31   : > { %p46_p11 = scmp.eq.s32.totalorder %s43_s27, 0  ;;  %s190_s26 = sand.u32 1, %s1919_s14  }
  0x32   : > { %s1297_s4 = sshll.u32 %s190_s26, 4  ;;  %s1309_s6 = sshll.u32 %s1927_s16, 8 }
  0x33   : > { %s2063_s5 = scalar_select %p46_p11, %s1919_s14, %s48_s25  }
  0x34   : > { %s2069_s9 = scalar_lea.hbm %s2578_s0, %s1309_s6  ;;  %s194_s21 = scalar_lea.vmem [#allocation2], %s1297_s4 }
  0x35   : > { %s204_s10 = sshll.u32 %s194_s21, 4  ;;  %p2075_p13 = pnand %p1733_p12, %p2048_p6  ;;  %s2071_s10 = int_to_ptr.vmem [resolvable:$true] %s204_s10 }
  0x36   : > { %s191_s18 = scalar_lea.sflag [#allocation3], %s190_s26  ;;  %s1815_s19 = scalar_lea.hbm %s2069_s9, 256 }
  0x37   : > { %p1816_p0 = scmp.ne.s32.totalorder %s2069_s9, %s1815_s19  ;;  %p1817_p3 = pneg %p2075_p13 }
  0x38   : > { %s1820_s4 = scalar_lea.hbm %s2578_s0, 512  ;;  %p1821_p9 = scmp.lt.u32.totalorder %s2069_s9, %s2578_s0 }
  0x39   : > { %p1818_p5 = pnand %p1817_p3, %p1816_p0  ;;  %p1822_p1 = scmp.lt.u32.totalorder %s1820_s4, %s1815_s19 }
  0x3a   : > { %p1824_p4 = scmp.lt.u32.totalorder %s1815_s19, %s2069_s9 }
  0x3b   : > { %p1819_p7 = pneg %p1818_p5  ;;  %p1823_p2 = por %p1822_p1, %p1821_p9 }
  0x3d   : > { %p1825_p6 = por %p1824_p4, %p1823_p2 }
  0x3f   : > { %p1826_p8 = pnand %p1825_p6, %p1819_p7 }
  0x41   : > { %1829 = shalt.err (!%p1826_p8)
}
  0x42   : > { %s1830_s26 = scalar_lea.vmem %s2071_s10, 256  ;;  %s1936_s7 = smov [#allocation2]  }
  0x43   : > { %p1831_p12 = scmp.ne.s32.totalorder %s2071_s10, %s1830_s26  ;;  %s1835_s8 = sshll.u32 %s1936_s7, 4  ;;  %s1836_s8 = int_to_ptr.vmem [resolvable:$false] %s1835_s8 }
  0x44   : > { %s1837_s21 = scalar_lea.vmem %s1836_s8, 512  ;;  %p1838_p5 = scmp.lt.s32.totalorder %s2071_s10, %s1836_s8 }
  0x45   : > { %p1833_p11 = pnand %p1831_p12, %p1817_p3  ;;  %p1839_p9 = scmp.lt.s32.totalorder %s1837_s21, %s1830_s26 }
  0x47   : > { %p1834_p0 = pneg %p1833_p11  ;;  %p1840_p1 = por %p1839_p9, %p1838_p5 }
  0x49   : > { %p1841_p2 = pnand %p1840_p1, %p1834_p0 }
  0x4b   : > { %1844 = shalt.err (!%p1841_p2)
}
  0x4c   : > { %1727 = dma.hbm_to_vmem [thread:$0]  (!%p2075_p13), %s2069_s9, 256, %s2071_s10, %s191_s18  }
  0x4d   : > { %p2641_p7 = scmp.ne.s32.totalorder %s2635_s24, 0 }
  0x4f   : > { %213 = sbr.rel (%p2641_p7) target bundleno = 451 (0x1c3), region = 32 }
  0x56   : > { %s2107_s19 = sand.u32 1, %s1915_s13   ;;  %p2642_p3 = scmp.ne.s32.totalorder %s2633_s22, 0 }
  0x57   : > { %s1301_s25 = sshll.u32 %s2107_s19, 4  ;;  %s216_s27 = scalar_lea.sflag [#allocation3], %s2107_s19 }
  0x58   : > { %s2111_s4 = scalar_lea.vmem [#allocation2], %s1301_s25 }
  0x59   : > { %1898 = dma.done.wait (%p2642_p3), %s216_s27, 256  }
  0x5a   : > { %1900 = vsyncadd (%p2642_p3), %s216_s27, 4294967040  ;;  %p2643_p13 = scmp.ne.s32.totalorder %s2631_s20, 0 }
  0x5c   : > { %1902 = dma.done.wait (%p2643_p13), [#allocation6], 4096  }
  0x5d   : > { %1904 = vsyncadd (%p2643_p13), [#allocation6], 4294963200  ;;  %v285_v0 = vld [vmem:[#allocation5 + $0x80] sm:$0xff]  ;;  %v286_v1 = vld [vmem:[#allocation5 + $0x88] sm:$0xff]  ;;  %s1303_s20 = sshll.u32 %s2107_s19, 3  ;;  %s1306_s9 = sshll.u32 %s1923_s15, 7 }
  0x5e   : > { %v269_v2 = vld [vmem:[#allocation5] sm:$0xff]  ;;  %v350_v3 = vand.u32 4294901760, %v285_v0  ;;  %v353_v4 = vand.u32 4294901760, %v286_v1  ;;  %v270_v5 = vld [vmem:[#allocation5 + $0x8] sm:$0xff]  ;;  %v287_v7 = vld [vmem:[#allocation5 + $0x90] sm:$0xff]  ;;  %s248_s10 = scalar_lea.vmem [#allocation7], %s1303_s20  ;;  %s2529_s6 = scalar_lea.hbm %s2581_s3, %s1306_s9 }
  0x5f   : > { %v302_v6 = vand.u32 4294901760, %v269_v2  ;;  %v288_v8 = vld [vmem:[#allocation5 + $0x98] sm:$0xff]  ;;  %v305_v9 = vand.u32 4294901760, %v270_v5  ;;  %v356_v10 = vand.u32 4294901760, %v287_v7  ;;  %v271_v12 = vld [vmem:[#allocation5 + $0x10] sm:$0xff]  ;;  %v289_v18 = vld [vmem:[#allocation5 + $0xa0] sm:$0xff] }
  0x60   : > { %v359_v11 = vand.u32 4294901760, %v288_v8  ;;  %v272_v13 = vld [vmem:[#allocation5 + $0x18] sm:$0xff]  ;;  %v2121_v14 = vpack.c.bf16 %v353_v4, %v350_v3  ;;  %v308_v16 = vand.u32 4294901760, %v271_v12  ;;  %v290_v19 = vld [vmem:[#allocation5 + $0xa8] sm:$0xff]  ;;  %v273_v23 = vld [vmem:[#allocation5 + $0x20] sm:$0xff]  ;;  %v362_v29 = vand.u32 4294901760, %v289_v18 }
  0x61   : > { %v2123_v15 = vsub.f32 %v269_v2, %v302_v6  ;;  %v311_v17 = vand.u32 4294901760, %v272_v13  ;;  %v2125_v20 = vpack.c.bf16 %v305_v9, %v302_v6  ;;  %v2127_v21 = vsub.f32 %v270_v5, %v305_v9  ;;  %v274_v24 = vld [vmem:[#allocation5 + $0x28] sm:$0xff]  ;;  %v291_v37 = vld [vmem:[#allocation5 + $0xb0] sm:$0xff]  ;;  %v292_v42 = vld [vmem:[#allocation5 + $0xb8] sm:$0xff]  ;;  %s1180_s11 = sshll.u32 %s248_s10, 4  ;;  %s1166_s26 = scalar_lea.sflag [#allocation4], %s2107_s19  ;;  %s2531_s11 = int_to_ptr.vmem [resolvable:$true] %s1180_s11 }
  0x62   : > { %v2129_v22 = vpack.c.bf16 %v359_v11, %v356_v10  ;;  %1521 = vmatprep.subr.bf16.mxu0 %v2121_v14  ;;  %v2132_v25 = vsub.f32 %v287_v7, %v356_v10  ;;  %v2134_v26 = vsub.f32 %v288_v8, %v359_v11  ;;  %v2138_v28 = vsub.f32 %v271_v12, %v308_v16  ;;  %v275_v55 = vld [vmem:[#allocation5 + $0x30] sm:$0xff]  ;;  %v276_v56 = vld [vmem:[#allocation5 + $0x38] sm:$0xff]  ;;  %v293_v5 = vld [vmem:[#allocation5 + $0xc0] sm:$0xff]  ;;  %s1845_s7 = scalar_lea.vmem %s2531_s11, 128  ;;  %s1937_s15 = smov [#allocation7]  }
  0x63   : > { %v2136_v27 = vpack.c.bf16 %v311_v17, %v308_v16  ;;  %1523 = vmatpush3.bf16.msra.mxu0 %v2125_v20  ;;  %v365_v30 = vand.u32 4294901760, %v290_v19  ;;  %v2141_v31 = vsub.f32 %v285_v0, %v350_v3  ;;  %v2143_v32 = vsub.f32 %v286_v1, %v353_v4  ;;  %v294_v6 = vld [vmem:[#allocation5 + $0xc8] sm:$0xff]  ;;  %v277_v11 = vld [vmem:[#allocation5 + $0x40] sm:$0xff]  ;;  %p1846_p4 = scmp.ne.s32.totalorder %s2531_s11, %s1845_s7  ;;  %s1849_s8 = sshll.u32 %s1937_s15, 4  ;;  %s1850_s8 = int_to_ptr.vmem [resolvable:$false] %s1849_s8 }
  0x64   : > { %1525 = vmatprep.subr.bf16.mxu0 %v2129_v22  ;;  %v314_v33 = vand.u32 4294901760, %v273_v23  ;;  %v317_v34 = vand.u32 4294901760, %v274_v24  ;;  %v2602_v35 = vand.u32 4294901760, %v2123_v15  ;;  %v2600_v36 = vand.u32 4294901760, %v2127_v21  ;;  %s1851_s21 = scalar_lea.vmem %s1850_s8, 256  ;;  %p1852_p12 = scmp.lt.s32.totalorder %s2531_s11, %s1850_s8 }
  0x65   : > { %v2148_v38 = vsub.f32 %v272_v13, %v311_v17  ;;  %v2150_v39 = vpack.c.bf16 %v365_v30, %v362_v29  ;;  %v2152_v40 = vsub.f32 %v289_v18, %v362_v29  ;;  %v2605_v41 = vand.u32 4294901760, %v2141_v31  ;;  %v278_v29 = vld [vmem:[#allocation5 + $0x48] sm:$0xff]  ;;  %p1847_p6 = pnand %p1846_p4, %p2054_p10  ;;  %p1853_p11 = scmp.lt.s32.totalorder %s1851_s21, %s1845_s7 }
  0x66   : > { %v2155_v43 = vsub.f32 %v290_v19, %v365_v30  ;;  %v2604_v44 = vand.u32 4294901760, %v2143_v32  ;;  %v2158_v45 = vpack.c.bf16 %v317_v34, %v314_v33  ;;  %v2160_v46 = vsub.f32 %v273_v23, %v314_v33 }
  0x67   : > { %1527 = vmatpush3.bf16.msra.mxu0 %v2136_v27  ;;  %v529_v47 = vsub.f32 %v2141_v31, %v2605_v41  ;;  %v417_v48 = vsub.f32 %v2123_v15, %v2602_v35  ;;  %v424_v49 = vsub.f32 %v2127_v21, %v2600_v36  ;;  %v368_v50 = vand.u32 4294901760, %v291_v37  ;;  %v267_v41 = vld [vmem:[%s2111_s4 + $0x8] sm:$0xff]  ;;  %p1848_p8 = pneg %p1847_p6  ;;  %p1854_p0 = por %p1853_p11, %p1852_p12 }
  0x68   : > { %1529 = vmatprep.subr.bf16.mxu0 %v2150_v39  ;;  %v536_v51 = vsub.f32 %v2143_v32, %v2604_v44  ;;  %v371_v52 = vand.u32 4294901760, %v292_v42  ;;  %v2598_v53 = vand.u32 4294901760, %v2132_v25  ;;  %v2596_v54 = vand.u32 4294901760, %v2134_v26 }
  0x69   : > { %v530_v57 = vand.u32 4294901760, %v529_v47  ;;  %v2178_v58 = vsub.f32 %v274_v24, %v317_v34  ;;  %v418_v59 = vand.u32 4294901760, %v417_v48  ;;  %v425_v60 = vand.u32 4294901760, %v424_v49  ;;  %p1855_p5 = pnand %p1854_p0, %p1848_p8 }
  0x6a   : > { %v537_v61 = vand.u32 4294901760, %v536_v51  ;;  %v2180_v62 = vpack.c.bf16 %v371_v52, %v368_v50  ;;  %v2182_v63 = vsub.f32 %v291_v37, %v368_v50  ;;  %v543_v0 = vsub.f32 %v2132_v25, %v2598_v53 }
  0x6b   : > { %1531 = vmatpush3.bf16.msra.mxu0 %v2158_v45  ;;  %v1554_v1 = vpack.c.bf16 %v425_v60, %v418_v59  ;;  %v550_v2 = vsub.f32 %v2134_v26, %v2596_v54  ;;  %v320_v3 = vand.u32 4294901760, %v275_v55  ;;  %v323_v4 = vand.u32 4294901760, %v276_v56  ;;  %v296_v59 = vld [vmem:[#allocation5 + $0xd8] sm:$0xff] }
  0x6c   : > { %v1552_v7 = vpack.c.bf16 %v537_v61, %v530_v57  ;;  %1533 = vmatprep.subr.bf16.mxu0 %v2180_v62  ;;  %v544_v8 = vand.u32 4294901760, %v543_v0  ;;  %v2595_v9 = vand.u32 4294901760, %v2138_v28  ;;  %v2593_v10 = vand.u32 4294901760, %v2148_v38  ;;  %v295_v57 = vld [vmem:[#allocation5 + $0xd0] sm:$0xff]  ;;  %v300_v54 = vld [vmem:[#allocation5 + $0xf8] sm:$0xff] }
  0x6d   : > { %v2194_v12 = vsub.f32 %v292_v42, %v371_v52  ;;  %v551_v13 = vand.u32 4294901760, %v550_v2  ;;  %v2196_v16 = vpack.c.bf16 %v323_v4, %v320_v3  ;;  %v2198_v17 = vsub.f32 %v275_v55, %v320_v3 }
  0x6e   : > { %1553 = vmatprep.subr.bf16.mxu1 %v1552_v7  ;;  %v431_v18 = vsub.f32 %v2138_v28, %v2595_v9  ;;  %v438_v19 = vsub.f32 %v2148_v38, %v2593_v10  ;;  %v374_v23 = vand.u32 4294901760, %v293_v5  ;;  %v377_v24 = vand.u32 4294901760, %v294_v6  ;;  %v299_v9 = vld [vmem:[#allocation5 + $0xf0] sm:$0xff] }
  0x6f   : > { %1555 = vmatpush3.bf16.msra.mxu1 %v1554_v1  ;;  %v1556_v30 = vpack.c.bf16 %v551_v13, %v544_v8  ;;  %1535 = vmatpush3.bf16.msra.mxu0 %v2196_v16  ;;  %v2591_v33 = vand.u32 4294901760, %v2152_v40  ;;  %v2590_v34 = vand.u32 4294901760, %v2155_v43  ;;  %v326_v37 = vand.u32 4294901760, %v277_v11  ;;  %v279_v1 = vld [vmem:[#allocation5 + $0x50] sm:$0xff] }
  0x70   : > { %v2209_v42 = vsub.f32 %v276_v56, %v323_v4  ;;  %v432_v47 = vand.u32 4294901760, %v431_v18  ;;  %v439_v48 = vand.u32 4294901760, %v438_v19  ;;  %v2211_v49 = vpack.c.bf16 %v377_v24, %v374_v23  ;;  %v280_v18 = vld [vmem:[#allocation5 + $0x58] sm:$0xff] }
  0x71   : > { %1557 = vmatprep.subr.bf16.mxu1 %v1556_v30  ;;  %v2213_v50 = vsub.f32 %v293_v5, %v374_v23  ;;  %v557_v51 = vsub.f32 %v2152_v40, %v2591_v33  ;;  %v564_v52 = vsub.f32 %v2155_v43, %v2590_v34  ;;  %v329_v55 = vand.u32 4294901760, %v278_v29 }
  0x72   : > { %v1558_v56 = vpack.c.bf16 %v439_v48, %v432_v47  ;;  %1537 = vmatprep.subr.bf16.mxu0 %v2211_v49  ;;  %v2222_v60 = vsub.f32 %v294_v6, %v377_v24  ;;  %v2588_v61 = vand.u32 4294901760, %v2160_v46  ;;  %v2586_v0 = vand.u32 4294901760, %v2178_v58 }
  0x73   : > { %v558_v2 = vand.u32 4294901760, %v557_v51  ;;  %v565_v3 = vand.u32 4294901760, %v564_v52  ;;  %v2226_v4 = vpack.c.bf16 %v329_v55, %v326_v37  ;;  %v2228_v5 = vsub.f32 %v277_v11, %v326_v37 }
  0x74   : > { %1559 = vmatpush3.bf16.msra.mxu1 %v1558_v56  ;;  %v445_v7 = vsub.f32 %v2160_v46, %v2588_v61  ;;  %v452_v6 = vsub.f32 %v2178_v58, %v2586_v0  ;;  %v380_v8 = vand.u32 4294901760, %v295_v57  ;;  %v383_v13 = vand.u32 4294901760, %v296_v59  ;;  %v298_v0 = vld [vmem:[#allocation5 + $0xe8] sm:$0xff] }
  0x75   : > { %v1560_v19 = vpack.c.bf16 %v565_v3, %v558_v2  ;;  %1539 = vmatpush3.bf16.msra.mxu0 %v2226_v4  ;;  %v2587_v23 = vand.u32 4294901760, %v2182_v63  ;;  %v2589_v11 = vand.u32 4294901760, %v2194_v12  ;;  %v332_v24 = vand.u32 4294901760, %v279_v1  ;;  %v297_v3 = vld [vmem:[#allocation5 + $0xe0] sm:$0xff] }
  0x76   : > { %v2239_v30 = vsub.f32 %v278_v29, %v329_v55  ;;  %v446_v37 = vand.u32 4294901760, %v445_v7  ;;  %v453_v47 = vand.u32 4294901760, %v452_v6  ;;  %v2241_v48 = vpack.c.bf16 %v383_v13, %v380_v8  ;;  %v281_v6 = vld [vmem:[#allocation5 + $0x60] sm:$0xff] }
  0x77   : > { %1561 = vmatprep.subr.bf16.mxu1 %v1560_v19  ;;  %v2243_v51 = vsub.f32 %v295_v57, %v380_v8  ;;  %v571_v52 = vsub.f32 %v2182_v63, %v2587_v23  ;;  %v578_v56 = vsub.f32 %v2194_v12, %v2589_v11  ;;  %v335_v2 = vand.u32 4294901760, %v280_v18  ;;  %v282_v11 = vld [vmem:[#allocation5 + $0x68] sm:$0xff] }
  0x78   : > { %v1562_v29 = vpack.c.bf16 %v453_v47, %v446_v37  ;;  %1541 = vmatprep.subr.bf16.mxu0 %v2241_v48  ;;  %v2252_v55 = vsub.f32 %v296_v59, %v383_v13  ;;  %v2592_v7 = vand.u32 4294901760, %v2198_v17  ;;  %v2594_v57 = vand.u32 4294901760, %v2209_v42 }
  0x79   : > { %v572_v8 = vand.u32 4294901760, %v571_v52  ;;  %v579_v19 = vand.u32 4294901760, %v578_v56  ;;  %v2256_v23 = vpack.c.bf16 %v335_v2, %v332_v24  ;;  %v2258_v61 = vsub.f32 %v279_v1, %v332_v24 }
  0x7a   : > { %1563 = vmatpush3.bf16.msra.mxu1 %v1562_v29  ;;  %v459_v37 = vsub.f32 %v2198_v17, %v2592_v7  ;;  %v466_v59 = vsub.f32 %v2209_v42, %v2594_v57  ;;  %v386_v13 = vand.u32 4294901760, %v297_v3  ;;  %v389_v47 = vand.u32 4294901760, %v298_v0 }
  0x7b   : > { %2644 = vst [vmem:[#allocation11_spill] sm:$0xff] %v2256_v23  ;;  %v1564_v34 = vpack.c.bf16 %v579_v19, %v572_v8  ;;  %1543 = vmatpush3.bf16.msra.mxu0 %v2256_v23  ;;  %v2597_v52 = vand.u32 4294901760, %v2213_v50  ;;  %v2599_v1 = vand.u32 4294901760, %v2222_v60  ;;  %v338_v24 = vand.u32 4294901760, %v281_v6 }
  0x7c   : > { %v2269_v56 = vsub.f32 %v280_v18, %v335_v2  ;;  %v460_v29 = vand.u32 4294901760, %v459_v37  ;;  %v467_v33 = vand.u32 4294901760, %v466_v59  ;;  %v2271_v7 = vpack.c.bf16 %v389_v47, %v386_v13  ;;  %v283_v37 = vld [vmem:[#allocation5 + $0x70] sm:$0xff] }
  0x7d   : > { %1565 = vmatprep.subr.bf16.mxu1 %v1564_v34  ;;  %v2273_v10 = vsub.f32 %v297_v3, %v386_v13  ;;  %v585_v8 = vsub.f32 %v2213_v50, %v2597_v52  ;;  %v592_v19 = vsub.f32 %v2222_v60, %v2599_v1  ;;  %v341_v57 = vand.u32 4294901760, %v282_v11  ;;  %v284_v1 = vld [vmem:[#allocation5 + $0x78] sm:$0xff] }
  0x7e   : > { %2645 = vst [vmem:[#allocation12_spill] sm:$0xff] %v2271_v7  ;;  %v1566_v18 = vpack.c.bf16 %v467_v33, %v460_v29  ;;  %1545 = vmatprep.subr.bf16.mxu0 %v2271_v7  ;;  %v2282_v2 = vsub.f32 %v298_v0, %v389_v47  ;;  %v2601_v34 = vand.u32 4294901760, %v2228_v5  ;;  %v2603_v3 = vand.u32 4294901760, %v2239_v30 }
  0x7f   : > { %v586_v59 = vand.u32 4294901760, %v585_v8  ;;  %v593_v13 = vand.u32 4294901760, %v592_v19  ;;  %v2286_v52 = vpack.c.bf16 %v341_v57, %v338_v24  ;;  %v2288_v53 = vsub.f32 %v281_v6, %v338_v24 }
  0x80   : > { %1567 = vmatpush3.bf16.msra.mxu1 %v1566_v18  ;;  %v473_v33 = vsub.f32 %v2228_v5, %v2601_v34  ;;  %v480_v0 = vsub.f32 %v2239_v30, %v2603_v3  ;;  %v392_v47 = vand.u32 4294901760, %v299_v9  ;;  %v395_v29 = vand.u32 4294901760, %v300_v54 }
  0x81   : > { %2646 = vst [vmem:[#allocation13_spill] sm:$0xff] %v2286_v52  ;;  %v1568_v36 = vpack.c.bf16 %v593_v13, %v586_v59  ;;  %1547 = vmatpush3.bf16.msra.mxu0 %v2286_v52  ;;  %v2608_v8 = vand.u32 4294901760, %v2243_v51  ;;  %v2609_v6 = vand.u32 4294901760, %v2252_v55  ;;  %v344_v24 = vand.u32 4294901760, %v283_v37 }
  0x82   : > { %v2299_v19 = vsub.f32 %v282_v11, %v341_v57  ;;  %v474_v18 = vand.u32 4294901760, %v473_v33  ;;  %v481_v34 = vand.u32 4294901760, %v480_v0  ;;  %v2301_v35 = vpack.c.bf16 %v395_v29, %v392_v47 }
  0x83   : > { %1569 = vmatprep.subr.bf16.mxu1 %v1568_v36  ;;  %v2303_v3 = vsub.f32 %v299_v9, %v392_v47  ;;  %v599_v59 = vsub.f32 %v2243_v51, %v2608_v8  ;;  %v606_v13 = vsub.f32 %v2252_v55, %v2609_v6  ;;  %v347_v44 = vand.u32 4294901760, %v284_v1  ;;  %v266_v9 = vld [vmem:[%s2111_s4] sm:$0xff] }
  0x84   : > { %2647 = vst [vmem:[#allocation14_spill] sm:$0xff] %v2301_v35  ;;  %v1570_v52 = vpack.c.bf16 %v481_v34, %v474_v18  ;;  %1549 = vmatprep.subr.bf16.mxu0 %v2301_v35  ;;  %v2313_v11 = vsub.f32 %v300_v54, %v395_v29  ;;  %v2610_v57 = vand.u32 4294901760, %v2258_v61  ;;  %v2611_v36 = vand.u32 4294901760, %v2269_v56 }
  0x85   : > { %v600_v33 = vand.u32 4294901760, %v599_v59  ;;  %v607_v0 = vand.u32 4294901760, %v606_v13  ;;  %v2318_v47 = vpack.c.bf16 %v347_v44, %v344_v24  ;;  %v2320_v8 = vsub.f32 %v283_v37, %v344_v24 }
  0x86   : > { %1571 = vmatpush3.bf16.msra.mxu1 %v1570_v52  ;;  %v487_v34 = vsub.f32 %v2258_v61, %v2610_v57  ;;  %v494_v54 = vsub.f32 %v2269_v56, %v2611_v36  ;;  %v2328_v29 = vand.u32 4294901760, %v267_v41  ;;  %v2614_v18 = vand.u32 4294901760, %v2273_v10 }
  0x87   : > { %2648 = vst [vmem:[#allocation15_spill] sm:$0xff] %v2318_v47  ;;  %v1572_v6 = vpack.c.bf16 %v607_v0, %v600_v33  ;;  %1551 = vmatpush3.bf16.msra.mxu0 %v2318_v47  ;;  %v2620_v59 = vand.u32 4294901760, %v2282_v2  ;;  %v1584_v52 = vpack.c.bf16 %v2143_v32, %v2141_v31  ;;  %v2335_v37 = vand.u32 4294901760, %v266_v9 }
  0x88   : > { %2649 = vst [vmem:[#allocation16_spill] sm:$0xff] %v2328_v29  ;;  %v488_v24 = vand.u32 4294901760, %v487_v34  ;;  %v495_v13 = vand.u32 4294901760, %v494_v54  ;;  %v2338_v57 = vsub.f32 %v267_v41, %v2328_v29  ;;  %v613_v36 = vsub.f32 %v2273_v10, %v2614_v18  ;;  %638 = vmatprep.mubr.f32.mxu1 %v2328_v29 }
  0x89   : > { %1573 = vmatprep.subr.bf16.mxu1 %v1572_v6  ;;  %v620_v33 = vsub.f32 %v2282_v2, %v2620_v59  ;;  %1585 = vmatprep.subr.bf16.mxu0 %v1584_v52  ;;  %v2348_v0 = vsub.f32 %v266_v9, %v2335_v37  ;;  %v2619_v34 = vand.u32 4294901760, %v2288_v53  ;;  %v2621_v41 = vand.u32 4294901760, %v2299_v19 }
  0x8a   : > { %v2352_v54 = vsub.f32 %v284_v1, %v347_v44  ;;  %v1574_v47 = vpack.c.bf16 %v495_v13, %v488_v24  ;;  %v2622_v18 = vand.u32 4294901760, %v2338_v57  ;;  %v614_v35 = vand.u32 4294901760, %v613_v36 }
  0x8b   : > { %v621_v29 = vand.u32 4294901760, %v620_v33  ;;  %v405_v6 = vand.u32 4294901760, %v2348_v0  ;;  %v501_v52 = vsub.f32 %v2288_v53, %v2619_v34  ;;  %v508_v9 = vsub.f32 %v2299_v19, %v2621_v41 }
  0x8c   : > { %1575 = vmatpush3.bf16.msra.mxu1 %v1574_v47  ;;  %v400_v44 = vsub.f32 %v2338_v57, %v2622_v18  ;;  %v1586_v1 = vpack.c.bf16 %v2127_v21, %v2123_v15  ;;  %v2627_v36 = vand.u32 4294901760, %v2303_v3  ;;  %v2630_v24 = vand.u32 4294901760, %v2313_v11 }
  0x8d   : > { %v1576_v13 = vpack.c.bf16 %v621_v29, %v614_v35  ;;  %v406_v33 = vsub.f32 %v2348_v0, %v405_v6  ;;  %v502_v34 = vand.u32 4294901760, %v501_v52  ;;  %v509_v59 = vand.u32 4294901760, %v508_v9 }
  0x8e   : > { %v401_v41 = vand.u32 4294901760, %v400_v44  ;;  %v627_v47 = vsub.f32 %v2303_v3, %v2627_v36  ;;  %v634_v18 = vsub.f32 %v2313_v11, %v2630_v24  ;;  %v2629_v7 = vand.u32 4294901760, %v2320_v8 }
  0x8f   : > { %1577 = vmatprep.subr.bf16.mxu1 %v1576_v13  ;;  %v407_v23 = vand.u32 4294901760, %v406_v33  ;;  %v1578_v35 = vpack.c.bf16 %v509_v59, %v502_v34  ;;  %v1588_v29 = vpack.c.bf16 %v2134_v26, %v2132_v25  ;;  %v2628_v52 = vand.u32 4294901760, %v2352_v54 }
  0x90   : > { %402 = vmatprep.mubr.f32.mxu0 %v401_v41  ;;  %v628_v9 = vand.u32 4294901760, %v627_v47  ;;  %v635_v44 = vand.u32 4294901760, %v634_v18  ;;  %v515_v36 = vsub.f32 %v2320_v8, %v2629_v7  ;;  %v1590_v33 = vpack.c.bf16 %v2148_v38, %v2138_v28 }
  0x91   : > { %408 = vmatmul.mubr.f32.vlgmr.msra.gmra.mrb[0].mxu0 %v407_v23  ;;  %1579 = vmatpush3.bf16.msra.mxu1 %v1578_v35  ;;  %v522_v13 = vsub.f32 %v2352_v54, %v2628_v52  ;;  %v1592_v41 = vpack.c.bf16 %v2155_v43, %v2152_v40  ;;  %v1594_v23 = vpack.c.bf16 %v2178_v58, %v2160_v46  ;;  %v2651_v35 = vand.u32 4294901760, %v2143_v32 }
  0x92   : > { %1587 = vmatpush3.bf16.msra.mxu0 %v1586_v1  ;;  %v1580_v59 = vpack.c.bf16 %v635_v44, %v628_v9  ;;  %v516_v34 = vand.u32 4294901760, %v515_v36  ;;  %775 = vmatprep.mubr.f32.mxu0 %v2338_v57  ;;  %v1596_v47 = vpack.c.bf16 %v2194_v12, %v2182_v63  ;;  %v2650_v36 = vand.u32 4294901760, %v2141_v31 }
  0x93   : > { %1589 = vmatprep.subr.bf16.mxu0 %v1588_v29  ;;  %v523_v18 = vand.u32 4294901760, %v522_v13  ;;  %v2652_v44 = vand.u32 4294901760, %v2123_v15  ;;  %v2653_v29 = vand.u32 4294901760, %v2127_v21  ;;  %v2654_v52 = vand.u32 4294901760, %v2132_v25 }
  0x94   : > { %1581 = vmatprep.subr.bf16.mxu1 %v1580_v59  ;;  %v1648_v9 = vpack.c.bf16 %v2651_v35, %v2650_v36  ;;  %v2655_v59 = vand.u32 4294901760, %v2134_v26  ;;  %v2656_v24 = vand.u32 4294901760, %v2138_v28  ;;  %v2658_v31 = vand.u32 4294901760, %v2152_v40 }
  0x95   : > { %v1582_v1 = vpack.c.bf16 %v523_v18, %v516_v34  ;;  %v1650_v13 = vpack.c.bf16 %v2653_v29, %v2652_v44  ;;  %v2657_v34 = vand.u32 4294901760, %v2148_v38  ;;  %v2659_v32 = vand.u32 4294901760, %v2155_v43  ;;  %v2674_v29 = vld [vmem:[#allocation13_spill] sm:$0xff] }
  0x96   : > { %v1652_v7 = vpack.c.bf16 %v2655_v59, %v2654_v52  ;;  %1591 = vmatpush3.bf16.msra.mxu0 %v1590_v33  ;;  %v2660_v15 = vand.u32 4294901760, %v2160_v46  ;;  %v2661_v21 = vand.u32 4294901760, %v2178_v58  ;;  %v2662_v25 = vand.u32 4294901760, %v2182_v63  ;;  %v2675_v59 = vld [vmem:[#allocation14_spill] sm:$0xff] }
  0x97   : > { %v1654_v18 = vpack.c.bf16 %v2657_v34, %v2656_v24  ;;  %v1656_v36 = vpack.c.bf16 %v2659_v32, %v2658_v31  ;;  %v2663_v26 = vand.u32 4294901760, %v2194_v12  ;;  %1583 = vmatpush3.bf16.msra.mxu1 %v1582_v1  ;;  %1593 = vmatprep.subr.bf16.mxu0 %v1592_v41  ;;  %v2664_v28 = vand.u32 4294901760, %v2198_v17  ;;  %v2676_v34 = vld [vmem:[#allocation15_spill] sm:$0xff] }
  0x98   : > { %v1658_v35 = vpack.c.bf16 %v2661_v21, %v2660_v15  ;;  %v2665_v38 = vand.u32 4294901760, %v2209_v42  ;;  %v2666_v43 = vand.u32 4294901760, %v2213_v50  ;;  %v2667_v24 = vand.u32 4294901760, %v2222_v60  ;;  %1617 = vmatprep.subr.bf16.mxu1 %v2121_v14 }
  0x99   : > { %v1660_v52 = vpack.c.bf16 %v2663_v26, %v2662_v25  ;;  %v2668_v58 = vand.u32 4294901760, %v2228_v5  ;;  %v2669_v33 = vand.u32 4294901760, %v2239_v30  ;;  %v1598_v12 = vpack.c.bf16 %v2209_v42, %v2198_v17 }
  0x9a   : > { %v1662_v40 = vpack.c.bf16 %v2665_v38, %v2664_v28  ;;  %v1664_v46 = vpack.c.bf16 %v2667_v24, %v2666_v43  ;;  %640 = vmatmul.mubr.f32.vlgmr.msra.gmra.mrb[0].mxu1 %v2335_v37  ;;  %1595 = vmatpush3.bf16.msra.mxu0 %v1594_v23  ;;  %v1600_v41 = vpack.c.bf16 %v2222_v60, %v2213_v50  ;;  %v2670_v1 = vand.u32 4294901760, %v2338_v57  ;;  %v2671_v57 = vld [vmem:[#allocation11_spill] sm:$0xff]  ;;  %v2672_v23 = vld [vmem:[#allocation12_spill] sm:$0xff]  ;;  %v1304_v38 = vld [vmem:[%s2580_s2] ss:$0 sm:$0xff] }
  0x9b   : > { %v1666_v63 = vpack.c.bf16 %v2669_v33, %v2668_v58  ;;  %1619 = vmatpush3.bf16.msra.mxu1 %v2125_v20  ;;  %1597 = vmatprep.subr.bf16.mxu0 %v1596_v47  ;;  %v1602_v44 = vpack.c.bf16 %v2239_v30, %v2228_v5  ;;  %v1604_v17 = vpack.c.bf16 %v2252_v55, %v2243_v51  ;;  %v2673_v47 = vld [vmem:[#allocation16_spill] sm:$0xff] }
  0x9c   : > { %1621 = vmatprep.subr.bf16.mxu1 %v2129_v22  ;;  %882 = vmatprep.mubr.f32.mxu1 %v2670_v1  ;;  %v1606_v42 = vpack.c.bf16 %v2269_v56, %v2258_v61  ;;  %v1608_v50 = vpack.c.bf16 %v2282_v2, %v2273_v10  ;;  %v1610_v60 = vpack.c.bf16 %v2299_v19, %v2288_v53 }
  0x9d   : > { %v1612_v5 = vpack.c.bf16 %v2313_v11, %v2303_v3  ;;  %v1614_v30 = vpack.c.bf16 %v2352_v54, %v2320_v8 }
  0x9e   : > { %1599 = vmatpush3.bf16.msra.mxu0 %v1598_v12 }
  0x9f   : > { %1623 = vmatpush3.bf16.msra.mxu1 %v2136_v27  ;;  %1601 = vmatprep.subr.bf16.mxu0 %v1600_v41 }
  0xa0   : > { %1625 = vmatprep.subr.bf16.mxu1 %v2150_v39 }
  0xa2   : > { %1603 = vmatpush3.bf16.msra.mxu0 %v1602_v44 }
  0xa3   : > { %1627 = vmatpush3.bf16.msra.mxu1 %v2158_v45  ;;  %1605 = vmatprep.subr.bf16.mxu0 %v1604_v17 }
  0xa4   : > { %1629 = vmatprep.subr.bf16.mxu1 %v2180_v62 }
  0xa6   : > { %1607 = vmatpush3.bf16.msra.mxu0 %v1606_v42 }
  0xa7   : > { %1631 = vmatpush3.bf16.msra.mxu1 %v2196_v16  ;;  %1609 = vmatprep.subr.bf16.mxu0 %v1608_v50 }
  0xa8   : > { %1633 = vmatprep.subr.bf16.mxu1 %v2211_v49 }
  0xaa   : > { %1611 = vmatpush3.bf16.msra.mxu0 %v1610_v60 }
  0xab   : > { %1635 = vmatpush3.bf16.msra.mxu1 %v2226_v4  ;;  %1613 = vmatprep.subr.bf16.mxu0 %v1612_v5 }
  0xac   : > { %1637 = vmatprep.subr.bf16.mxu1 %v2241_v48 }
  0xae   : > { %1615 = vmatpush3.bf16.msra.mxu0 %v1614_v30 }
  0xaf   : > { %1639 = vmatpush3.bf16.msra.mxu1 %v2671_v57  ;;  %1649 = vmatprep.subr.bf16.mxu0 %v1648_v9  ;;  %v2678_v9 = vand.u32 4294901760, %v2252_v55 }
  0xb0   : > { %1641 = vmatprep.subr.bf16.mxu1 %v2672_v23 }
  0xb1   : > { %778 = vmatmul.mubr.f32.vlgmr.msra.gmra.mrb[2].mxu0 %v2348_v0  ;;  %v2679_v0 = vand.u32 4294901760, %v2258_v61  ;;  %v2685_v61 = vand.u32 4294901760, %v2303_v3 }
  0xb2   : > { %1651 = vmatpush3.bf16.msra.mxu0 %v1650_v13  ;;  %1052 = vmatprep.mubr.f32.mxu0 %v2673_v47 }
  0xb3   : > { %1643 = vmatpush3.bf16.msra.mxu1 %v2674_v29  ;;  %1653 = vmatprep.subr.bf16.mxu0 %v1652_v7  ;;  %v2677_v7 = vand.u32 4294901760, %v2243_v51  ;;  %v2683_v51 = vand.u32 4294901760, %v2288_v53 }
  0xb4   : > { %1645 = vmatprep.subr.bf16.mxu1 %v2675_v59 }
  0xb6   : > { %1655 = vmatpush3.bf16.msra.mxu0 %v1654_v18 }
  0xb7   : > { %1647 = vmatpush3.bf16.msra.mxu1 %v2676_v34  ;;  %1657 = vmatprep.subr.bf16.mxu0 %v1656_v36 }
  0xb8   : > { %1681 = vmatprep.subr.bf16.mxu1 %v2121_v14  ;;  %v1668_v14 = vpack.c.bf16 %v2678_v9, %v2677_v7 }
  0xba   : > { %886 = vmatmul.mubr.f32.vlgmr.msra.gmra.mrb[2].mxu1 %v405_v6  ;;  %1659 = vmatpush3.bf16.msra.mxu0 %v1658_v35 }
  0xbb   : > { %1683 = vmatpush3.bf16.msra.mxu1 %v2125_v20  ;;  %1661 = vmatprep.subr.bf16.mxu0 %v1660_v52  ;;  %v2680_v20 = vand.u32 4294901760, %v2269_v56 }
  0xbc   : > { %1685 = vmatprep.subr.bf16.mxu1 %v2129_v22  ;;  %1156 = vmatprep.mubr.f32.mxu1 %v2673_v47  ;;  %v2681_v22 = vand.u32 4294901760, %v2273_v10  ;;  %v2687_v10 = vand.u32 4294901760, %v2320_v8 }
  0xbd   : > { %v1670_v6 = vpack.c.bf16 %v2680_v20, %v2679_v0 }
  0xbe   : > { %1663 = vmatpush3.bf16.msra.mxu0 %v1662_v40 }
  0xbf   : > { %1687 = vmatpush3.bf16.msra.mxu1 %v2136_v27  ;;  %1665 = vmatprep.subr.bf16.mxu0 %v1664_v46  ;;  %v2682_v27 = vand.u32 4294901760, %v2282_v2 }
  0xc0   : > { %1689 = vmatprep.subr.bf16.mxu1 %v2150_v39  ;;  %v2684_v39 = vand.u32 4294901760, %v2299_v19 }
  0xc1   : > { %v1672_v13 = vpack.c.bf16 %v2682_v27, %v2681_v22 }
  0xc2   : > { %1667 = vmatpush3.bf16.msra.mxu0 %v1666_v63  ;;  %v1674_v55 = vpack.c.bf16 %v2684_v39, %v2683_v51 }
  0xc3   : > { %1691 = vmatpush3.bf16.msra.mxu1 %v2158_v45  ;;  %1669 = vmatprep.subr.bf16.mxu0 %v1668_v14  ;;  %v2686_v45 = vand.u32 4294901760, %v2313_v11 }
  0xc4   : > { %1693 = vmatprep.subr.bf16.mxu1 %v2180_v62  ;;  %v2688_v62 = vand.u32 4294901760, %v2352_v54 }
  0xc5   : > { %v1676_v56 = vpack.c.bf16 %v2686_v45, %v2685_v61 }
  0xc6   : > { %1671 = vmatpush3.bf16.msra.mxu0 %v1670_v6  ;;  %v1678_v2 = vpack.c.bf16 %v2688_v62, %v2687_v10 }
  0xc7   : > { %1695 = vmatpush3.bf16.msra.mxu1 %v2196_v16  ;;  %1673 = vmatprep.subr.bf16.mxu0 %v1672_v13 }
  0xc8   : > { %1697 = vmatprep.subr.bf16.mxu1 %v2211_v49 }
  0xca   : > { %1675 = vmatpush3.bf16.msra.mxu0 %v1674_v55 }
  0xcb   : > { %1699 = vmatpush3.bf16.msra.mxu1 %v2226_v4  ;;  %1677 = vmatprep.subr.bf16.mxu0 %v1676_v56 }
  0xcc   : > { %1701 = vmatprep.subr.bf16.mxu1 %v2241_v48 }
  0xce   : > { %1679 = vmatpush3.bf16.msra.mxu0 %v1678_v2 }
  0xcf   : > { %1703 = vmatpush3.bf16.msra.mxu1 %v2671_v57 }
  0xd0   : > { %1705 = vmatprep.subr.bf16.mxu1 %v2672_v23 }
  0xd1   : > { %1054 = vmatmul.mubr.f32.vlgmr.msra.gmra.mrb[4].mxu0 %v2335_v37 }
  0xd3   : > { %1707 = vmatpush3.bf16.msra.mxu1 %v2674_v29 }
  0xd4   : > { %1709 = vmatprep.subr.bf16.mxu1 %v2675_v59 }
  0xd7   : > { %1711 = vmatpush3.bf16.msra.mxu1 %v2676_v34 }
  0xda   : > { %1158 = vmatmul.mubr.f32.vlgmr.msra.gmra.mrb[4].mxu1 %v2335_v37 }
 0x164   : > { %v1342_v53 = vpop.f32.mrb[0].mxu0 }
 0x165   : > { %v1343_v16 = vpop.f32.mrb[1].mxu0 }
 0x166   : > { %v1344_v49 = vadd.f32 %v1343_v16, %v1342_v53 }
 0x16d   : > { %v1377_v4 = vpop.f32.mrb[0].mxu1 }
 0x16e   : > { %v1378_v48 = vpop.f32.mrb[1].mxu1 }
 0x16f   : > { %v1379_v3 = vadd.f32 %v1378_v48, %v1377_v4 }
 0x171   : > { %v642_v8 = vadd.f32 %v1379_v3, %v1344_v49 }
 0x184   : > { %v1412_v19 = vpop.f32.mrb[2].mxu0 }
 0x185   : > { %v1413_v11 = vpop.f32.mrb[3].mxu0 }
 0x186   : > { %v1414_v54 = vadd.f32 %v1413_v11, %v1412_v19 }
 0x188   : > { %v780_v18 = vadd.f32 %v1414_v54, %v642_v8 }
 0x18d   : > { %v1447_v31 = vpop.f32.mrb[2].mxu1 }
 0x18e   : > { %v1448_v32 = vpop.f32.mrb[3].mxu1 }
 0x18f   : > { %v1449_v36 = vadd.f32 %v1448_v32, %v1447_v31 }
 0x191   : > { %v888_v15 = vadd.f32 %v1449_v36, %v780_v18 }
 0x1a4   : > { %v1482_v21 = vpop.f32.mrb[4].mxu0 }
 0x1a5   : > { %v1483_v35 = vpop.f32.mrb[5].mxu0 }
 0x1a6   : > { %v1484_v37 = vadd.f32 %v1483_v35, %v1482_v21 }
 0x1a8   : > { %v1056_v25 = vadd.f32 %v1484_v37, %v888_v15 }
 0x1ad   : > { %v1517_v26 = vpop.f32.mrb[4].mxu1 }
 0x1ae   : > { %v1518_v52 = vpop.f32.mrb[5].mxu1 }
 0x1af   : > { %v1519_v28 = vadd.f32 %v1518_v52, %v1517_v26 }
 0x1b1   : > { %v1160_v40 = vadd.f32 %v1519_v28, %v1056_v25 }
 0x1b3   : > { %v1163_v43 = vadd.f32 %v1304_v38, %v1160_v40 }
 0x1b5   : > { %1164 = vst [vmem:[%s248_s10] sm:$0xff] %v1163_v43 }
 0x1b6   : > { %1858 = shalt.err (!%p1855_p5)
}
 0x1b7   : > { %s1859_s19 = scalar_lea.hbm %s2529_s6, 128  ;;  %s1863_s4 = scalar_lea.hbm %s2581_s3, 256 }
 0x1b8   : > { %p1860_p9 = scmp.ne.s32.totalorder %s2529_s6, %s1859_s19  ;;  %p1864_p7 = scmp.lt.u32.totalorder %s2529_s6, %s2581_s3 }
 0x1b9   : > { %p1865_p3 = scmp.lt.u32.totalorder %s1863_s4, %s1859_s19  ;;  %p1867_p4 = scmp.lt.u32.totalorder %s1859_s19, %s2529_s6 }
 0x1ba   : > { %p1861_p1 = pnand %p1860_p9, %p2054_p10 }
 0x1bb   : > { %p1866_p13 = por %p1865_p3, %p1864_p7 }
 0x1bc   : > { %p1862_p2 = pneg %p1861_p1 }
 0x1bd   : > { %p1868_p6 = por %p1867_p4, %p1866_p13 }
 0x1bf   : > { %p1869_p8 = pnand %p1868_p6, %p1862_p2 }
 0x1c1   : > { %1872 = shalt.err (!%p1869_p8)
}
 0x1c2   : > { %1718 = dma.vmem_to_hbm [thread:$0]  (%p2054_p10), %s2531_s11, 128, %s2529_s6, %s1166_s26  }
 0x1c3 PF: > { %s1192_s24 = sand.u32 1, %s1911_s12   ;;  %p2689_p12 = scmp.ne.s32.totalorder %s2634_s23, 0 }
 0x1c4   : > { %p2690_p11 = scmp.ge.s32.totalorder %s1931_s17, 2  ;;  %s1193_s9 = scalar_lea.sflag [#allocation4], %s1192_s24 }
 0x1c6   : > { %p1729_p0 = pnand %p2690_p11, %p2689_p12 }
 0x1c8   : > { %1906 = dma.done.wait (!%p1729_p0), %s1193_s9, 128  }
 0x1c9   : > { %1908 = vsyncadd (!%p1729_p0), %s1193_s9, 4294967168  ;;  %s20_s17 = sadd.s32 1, %s1931_s17   ;;  %s2691_s12 = smov %s1915_s13 }
 0x1ca   : > { %p17_p5 = scmp.ge.s32.totalorder %s20_s17, 4   ;;  %s2692_s13 = smov %s1919_s14 }
 0x1cb   : > { %s2693_s14 = smov %s2063_s5  ;;  %s2694_s15 = smov %s1927_s16 }
 0x1cc   : > { %s2695_s16 = smov %s2697_s28  ;;  %19 = sbr.rel (!%p17_p5) target bundleno = 7 (0x7), region = 89 }
 0x1d3   :  { %1198 = vsyncpa [#allocation3], 1 }
 0x1d4   :  { %1200 = vsyncpa [#allocation3 + $0x1], 1 }
 0x1d5   :  { %1201 = vsyncpa [#allocation6], 1 }
 0x1d6   :  { %1202 = vsyncpa [#allocation4], 1 }
 0x1d7   :  { %1204 = vsyncpa [#allocation4 + $0x1], 1 }

</bundles_post_ra>
